<compile_context>
chip_gen: v5e
topology: v5e:2x2
jax: 0.10.0
libtpu: 0.0.40
codegen_flags: <defaults>
</compile_context>

<pallas_src>
import functools

import jax
import jax.numpy as jnp
from jax.experimental import pallas as pl
from jax.experimental.pallas import tpu as pltpu
from jax.scipy.linalg import block_diag

HIDDEN = 32   # config.hidden_dim
FILTER = 64   # config.filter
GRAIN = 16    # row-tile granularity (bf16-friendly sublane multiple)


def _ceil_to(a, m):
    return ((a + m - 1) // m) * m


# ----------------------------------------------------------------------------
# Fused kernel: one merged 256-lane FFN + reparameterization + per-tile KLD.
# ----------------------------------------------------------------------------
def latent_fused_kernel(x_ref, xp_ref, eps_ref,
                        w1x_ref, w1xp_ref, b1_ref, w2_ref, b2_ref, w3_ref, b3_ref,
                        z_ref, kld_ref, *, n_valid, tm):
    f32 = jnp.float32
    bf16 = jnp.bfloat16

    x = x_ref[...]     # (tm, 32) bf16
    xp = xp_ref[...]   # (tm, 32) bf16

    # Layer 1: merged 256-lane hidden [mean | var | mean_p | var_p] (64 each).
    # The torch.cat((x_p, x)) of the prior path is folded into the split
    # weights w1x / w1xp, so no concat is ever materialized.
    h = (jnp.dot(x, w1x_ref[...], preferred_element_type=f32)
         + jnp.dot(xp, w1xp_ref[...], preferred_element_type=f32)
         + b1_ref[...])
    h = jnp.maximum(h, 0.0).astype(bf16)                       # (tm, 256)

    # Layer 2: 4-way block-diagonal (256, 256).
    h = jnp.dot(h, w2_ref[...], preferred_element_type=f32) + b2_ref[...]
    h = jnp.maximum(h, 0.0).astype(bf16)                       # (tm, 256)

    # Layer 3: 4-way block-diagonal (256, 128) -> [mean|log_var|mean_p|log_var_p]
    mv = jnp.dot(h, w3_ref[...], preferred_element_type=f32) + b3_ref[...]
    mv = jnp.maximum(mv, 0.0)   # repo's PFF applies ReLU after the last layer too

    mean = mv[:, 0 * HIDDEN:1 * HIDDEN]
    logvar = mv[:, 1 * HIDDEN:2 * HIDDEN]
    meanp = mv[:, 2 * HIDDEN:3 * HIDDEN]
    logvarp = mv[:, 3 * HIDDEN:4 * HIDDEN]

    # z = eps * exp(0.5 * log_var_p) + mean_p   (train branch of Latent.forward)
    z = eps_ref[...].astype(f32) * jnp.exp(0.5 * logvarp) + meanp
    z_ref[...] = z.astype(z_ref.dtype)

    # gaussian_kld(recog=(mean_p, log_var_p), prior=(mean, log_var)).
    # exp(lvp - lv) computed once; exp(-lv) kept only for the squared-mean term.
    inv_prior_var = jnp.exp(-logvar)
    dlv = logvarp - logvar
    term = 1.0 + dlv - jnp.square(mean - meanp) * inv_prior_var - jnp.exp(dlv)
    kld_row = -0.5 * jnp.sum(term, axis=-1, keepdims=True)     # (tm, 1)

    # Mask padded tail rows, reduce to ONE scalar per tile, emit as a dense
    # (8,128) block (no 1-lane masked stores, no (tm,1) VMEM padding).
    rid = pl.program_id(0) * tm + jax.lax.broadcasted_iota(jnp.int32, kld_row.shape, 0)
    kld_row = jnp.where(rid < n_valid, kld_row, 0.0)
    kld_ref[...] = jnp.broadcast_to(jnp.sum(kld_row), (1, 8, 128))


def latent_fused(xf, xpf, epsf, packed, *, n_valid, tm, z_dtype):
    """xf/xpf/epsf: (n_pad, HIDDEN) padded, row-flattened bf16 inputs."""
    n_pad = xf.shape[0]
    grid = n_pad // tm
    row_spec = pl.BlockSpec((tm, HIDDEN), lambda i: (i, 0))
    # Constant-index weight/bias blocks (fetched once; double-buffering them is
    # ~230 KB of dead VMEM -- could be pl.Buffered(1), left default for safety).
    const_spec = lambda a: pl.BlockSpec(a.shape, lambda i: (0,) * a.ndim)

    z_pad, kld_tiles = pl.pallas_call(
        functools.partial(latent_fused_kernel, n_valid=n_valid, tm=tm),
        out_shape=(jax.ShapeDtypeStruct((n_pad, HIDDEN), z_dtype),
                   jax.ShapeDtypeStruct((grid, 8, 128), jnp.float32)),
        grid_spec=pltpu.PrefetchScalarGridSpec(
            num_scalar_prefetch=0,
            grid=(grid,),
            in_specs=[row_spec, row_spec, row_spec] + [const_spec(w) for w in packed],
            out_specs=[row_spec, pl.BlockSpec((1, 8, 128), lambda i: (i, 0, 0))],
        ),
        compiler_params=pltpu.CompilerParams(dimension_semantics=("parallel",)),
    )(xf, xpf, epsf, *packed)
    return z_pad, kld_tiles


# ----------------------------------------------------------------------------
# Weight packing: all four FFNs merged into one 256-lane network (bf16 weights).
# ----------------------------------------------------------------------------
def pack_latent_params(params, w_dtype=jnp.bfloat16):
    w1m, b1m, w2m, b2m, w3m, b3m = params["mean"]
    w1v, b1v, w2v, b2v, w3v, b3v = params["var"]
    w1mp, b1mp, w2mp, b2mp, w3mp, b3mp = params["mean_p"]
    w1vp, b1vp, w2vp, b2vp, w3vp, b3vp = params["var_p"]

    cat = lambda *a: jnp.concatenate(a, axis=1)

    # Prior-path input is cat(x_p, x): rows [:HIDDEN] of its layer-1 weights
    # multiply x_p, rows [HIDDEN:] multiply x.  Merged hidden lane layout is
    # [mean(64) | var(64) | mean_p(64) | var_p(64)].
    zeros = jnp.zeros((HIDDEN, 2 * FILTER), jnp.float32)
    w1x = cat(w1m, w1v, w1mp[HIDDEN:], w1vp[HIDDEN:])    # (32, 256)
    w1xp = cat(zeros, w1mp[:HIDDEN], w1vp[:HIDDEN])      # (32, 256)
    b1 = cat(b1m, b1v, b1mp, b1vp)                       # (1, 256)
    w2 = block_diag(w2m, w2v, w2mp, w2vp)                # (256, 256)
    b2 = cat(b2m, b2v, b2mp, b2vp)                       # (1, 256)
    w3 = block_diag(w3m, w3v, w3mp, w3vp)                # (256, 128) -> [m|lv|mp|lvp]
    b3 = cat(b3m, b3v, b3mp, b3vp)                       # (1, 128)

    wc = lambda w: w.astype(w_dtype)
    return (wc(w1x), wc(w1xp), b1, wc(w2), b2, wc(w3), b3)   # biases stay f32


# ----------------------------------------------------------------------------
# End-to-end Latent forward (single fused pallas_call).
# ----------------------------------------------------------------------------
def latent_forward(x, x_p, params, eps, *, tm=1024, z_dtype=jnp.float32):
    """x, x_p, eps: (B, S, HIDDEN). Returns (kld_loss scalar, z (B, S, HIDDEN))."""
    b, s, h = x.shape
    n = b * s
    xf = x.reshape(n, h).astype(jnp.bfloat16)
    xpf = x_p.reshape(n, h).astype(jnp.bfloat16)
    epsf = eps.reshape(n, h).astype(jnp.bfloat16)

    # Row-tile selection: as large as requested (default 1024), but keep the
    # grid >= 2 when there is enough work so the "parallel" axis can span both
    # v7x TensorCores; padded tail is masked in-kernel, never asserted away.
    tm_eff = max(GRAIN, (tm // GRAIN) * GRAIN)
    if n > GRAIN:
        tm_eff = min(tm_eff, _ceil_to(-(-n // 2), GRAIN))
    else:
        tm_eff = GRAIN
    n_pad = _ceil_to(n, tm_eff)
    pad = n_pad - n
    if pad:
        xf = jnp.pad(xf, ((0, pad), (0, 0)))
        xpf = jnp.pad(xpf, ((0, pad), (0, 0)))
        epsf = jnp.pad(epsf, ((0, pad), (0, 0)))

    packed = pack_latent_params(params)
    z_pad, kld_tiles = latent_fused(xf, xpf, epsf, packed,
                                    n_valid=n, tm=tm_eff, z_dtype=z_dtype)

    kld = jnp.sum(kld_tiles[:, 0, 0]) / n          # torch.mean over (B, S)
    z = z_pad[:n].reshape(b, s, h)
    return kld, z


# ----------------------------------------------------------------------------
# Parameter construction (deterministic) + pure-JAX f32 reference.
# ----------------------------------------------------------------------------
def make_ffn_params(key, d_in, d_filter, d_out):
    ks = jax.random.split(key, 6)
    sc = 0.1
    w1 = sc * jax.random.normal(ks[0], (d_in, d_filter), jnp.float32)
    w2 = sc * jax.random.normal(ks[1], (d_filter, d_filter), jnp.float32)
    w3 = sc * jax.random.normal(ks[2], (d_filter, d_out), jnp.float32)
    b1 = sc * jax.random.normal(ks[3], (1, d_filter), jnp.float32)
    b2 = sc * jax.random.normal(ks[4], (1, d_filter), jnp.float32)
    b3 = sc * jax.random.normal(ks[5], (1, d_out), jnp.float32)
    return (w1, b1, w2, b2, w3, b3)


def latent_forward_ref(x, x_p, params, eps):
    """Pure-JAX f32 reference (module semantics) for verification."""
    hi = jax.lax.Precision.HIGHEST

    def pff(v, p):
        w1, b1, w2, b2, w3, b3 = p
        v = jnp.maximum(jnp.dot(v, w1, precision=hi) + b1, 0.0)
        v = jnp.maximum(jnp.dot(v, w2, precision=hi) + b2, 0.0)
        v = jnp.maximum(jnp.dot(v, w3, precision=hi) + b3, 0.0)
        return v

    b, s, h = x.shape
    xf = x.reshape(b * s, h)
    xc = jnp.concatenate((x_p.reshape(b * s, h), xf), axis=-1)
    mean, log_var = pff(xf, params["mean"]), pff(xf, params["var"])
    mean_p, log_var_p = pff(xc, params["mean_p"]), pff(xc, params["var_p"])
    kld = -0.5 * jnp.sum(1 + (log_var_p - log_var)
                         - jnp.square(mean - mean_p) / jnp.exp(log_var)
                         - jnp.exp(log_var_p) / jnp.exp(log_var), axis=-1)
    z = eps.reshape(b * s, h) * jnp.exp(0.5 * log_var_p) + mean_p
    return jnp.mean(kld), z.reshape(b, s, h)


if __name__ == "__main__":
    key = jax.random.PRNGKey(0)
    k_m, k_v, k_mp, k_vp = jax.random.split(key, 4)
    params = {
        "mean":   make_ffn_params(k_m,  HIDDEN,     FILTER, HIDDEN),
        "var":    make_ffn_params(k_v,  HIDDEN,     FILTER, HIDDEN),
        "mean_p": make_ffn_params(k_mp, HIDDEN * 2, FILTER, HIDDEN),
        "var_p":  make_ffn_params(k_vp, HIDDEN * 2, FILTER, HIDDEN),
    }

    def check(B, S, tm, seed):
        ks = jax.random.split(jax.random.PRNGKey(seed), 3)
        x = jax.random.normal(ks[0], (B, S, HIDDEN), jnp.float32)
        x_p = jax.random.normal(ks[1], (B, S, HIDDEN), jnp.float32)
        eps = jax.random.normal(ks[2], (B, S, HIDDEN), jnp.float32)  # torch.randn counterpart

        kld, z = latent_forward(x, x_p, params, eps, tm=tm)
        jax.block_until_ready((kld, z))

        kld_ref, z_ref = latent_forward_ref(x, x_p, params, eps)
        # bf16 MXU operands / bf16 input streams vs f32 HIGHEST reference.
        assert jnp.allclose(z, z_ref, atol=5e-2, rtol=5e-2), "z mismatch"
        assert jnp.allclose(kld, kld_ref, atol=5e-2, rtol=5e-2), "kld mismatch"

    check(2, 8, 1024, seed=1)   # small shape from the module spec (single tile)
    check(2, 11, 16, seed=2)    # multi-tile grid + padded/masked tail coverage
    print("KERNEL_OK")
</pallas_src>

<mosaic_0001>
module attributes {stable_mosaic.version = 11 : i64} {
  func.func @latent_fused_kernel(%arg0: i32, %arg1: memref<16x32xbf16, #tpu.memory_space<vmem>>, %arg2: memref<16x32xbf16, #tpu.memory_space<vmem>>, %arg3: memref<16x32xbf16, #tpu.memory_space<vmem>>, %arg4: memref<32x256xbf16, #tpu.memory_space<vmem>>, %arg5: memref<32x256xbf16, #tpu.memory_space<vmem>>, %arg6: memref<1x256xf32, #tpu.memory_space<vmem>>, %arg7: memref<256x256xbf16, #tpu.memory_space<vmem>>, %arg8: memref<1x256xf32, #tpu.memory_space<vmem>>, %arg9: memref<256x128xbf16, #tpu.memory_space<vmem>>, %arg10: memref<1x128xf32, #tpu.memory_space<vmem>>, %arg11: memref<16x32xf32, #tpu.memory_space<vmem>>, %arg12: memref<1x8x128xf32, #tpu.memory_space<vmem>>) attributes {dimension_semantics = [#tpu.dimension_semantics<parallel>], iteration_bounds = array<i64: 1>, scalar_prefetch = 0 : i64, scratch_operands = 0 : i64, tpu.core_type = #tpu.core_type<tc>, window_params = [{transform_indices = @transform_0, window_bounds = array<i64: 16, 32>}, {transform_indices = @transform_1, window_bounds = array<i64: 16, 32>}, {transform_indices = @transform_2, window_bounds = array<i64: 16, 32>}, {pipeline_mode = #tpu.pipeline_mode<synchronous>, transform_indices = @transform_3, window_bounds = array<i64: 32, 256>}, {pipeline_mode = #tpu.pipeline_mode<synchronous>, transform_indices = @transform_4, window_bounds = array<i64: 32, 256>}, {pipeline_mode = #tpu.pipeline_mode<synchronous>, transform_indices = @transform_5, window_bounds = array<i64: 1, 256>}, {pipeline_mode = #tpu.pipeline_mode<synchronous>, transform_indices = @transform_6, window_bounds = array<i64: 256, 256>}, {pipeline_mode = #tpu.pipeline_mode<synchronous>, transform_indices = @transform_7, window_bounds = array<i64: 1, 256>}, {pipeline_mode = #tpu.pipeline_mode<synchronous>, transform_indices = @transform_8, window_bounds = array<i64: 256, 128>}, {pipeline_mode = #tpu.pipeline_mode<synchronous>, transform_indices = @transform_9, window_bounds = array<i64: 1, 128>}, {transform_indices = @transform_10, window_bounds = array<i64: 16, 32>}, {transform_indices = @transform_11, window_bounds = array<i64: 1, 8, 128>}]} {
    %c0 = arith.constant 0 : index
    %c0_0 = arith.constant 0 : index
    %0 = vector.load %arg1[%c0, %c0_0] : memref<16x32xbf16, #tpu.memory_space<vmem>>, vector<16x32xbf16>
    %c0_1 = arith.constant 0 : index
    %c0_2 = arith.constant 0 : index
    %1 = vector.load %arg2[%c0_1, %c0_2] : memref<16x32xbf16, #tpu.memory_space<vmem>>, vector<16x32xbf16>
    %c0_3 = arith.constant 0 : index
    %c0_4 = arith.constant 0 : index
    %2 = vector.load %arg4[%c0_3, %c0_4] : memref<32x256xbf16, #tpu.memory_space<vmem>>, vector<32x256xbf16>
    %cst = arith.constant dense<0.000000e+00> : vector<16x256xf32>
    %3 = tpu.matmul %0, %2, %cst {dimension_numbers = #tpu.dot_dimension_numbers<[1], [0], [0], [1], [0, 0, 1, 1], [], []>} : vector<16x32xbf16>, vector<32x256xbf16>, vector<16x256xf32> -> vector<16x256xf32>
    %c0_5 = arith.constant 0 : index
    %c0_6 = arith.constant 0 : index
    %4 = vector.load %arg5[%c0_5, %c0_6] : memref<32x256xbf16, #tpu.memory_space<vmem>>, vector<32x256xbf16>
    %cst_7 = arith.constant dense<0.000000e+00> : vector<16x256xf32>
    %5 = tpu.matmul %1, %4, %cst_7 {dimension_numbers = #tpu.dot_dimension_numbers<[1], [0], [0], [1], [0, 0, 1, 1], [], []>} : vector<16x32xbf16>, vector<32x256xbf16>, vector<16x256xf32> -> vector<16x256xf32>
    %6 = arith.addf %3, %5 : vector<16x256xf32>
    %c0_8 = arith.constant 0 : index
    %c0_9 = arith.constant 0 : index
    %7 = vector.load %arg6[%c0_8, %c0_9] : memref<1x256xf32, #tpu.memory_space<vmem>>, vector<1x256xf32>
    %8 = vector.broadcast %7 : vector<1x256xf32> to vector<16x256xf32>
    %9 = arith.addf %6, %8 : vector<16x256xf32>
    %cst_10 = arith.constant 0.000000e+00 : f32
    %10 = vector.broadcast %cst_10 : f32 to vector<16x256xf32>
    %11 = arith.maximumf %9, %10 : vector<16x256xf32>
    %12 = arith.truncf %11 : vector<16x256xf32> to vector<16x256xbf16>
    %c0_11 = arith.constant 0 : index
    %c0_12 = arith.constant 0 : index
    %13 = vector.load %arg7[%c0_11, %c0_12] : memref<256x256xbf16, #tpu.memory_space<vmem>>, vector<256x256xbf16>
    %cst_13 = arith.constant dense<0.000000e+00> : vector<16x256xf32>
    %14 = tpu.matmul %12, %13, %cst_13 {dimension_numbers = #tpu.dot_dimension_numbers<[1], [0], [0], [1], [0, 0, 1, 1], [], []>} : vector<16x256xbf16>, vector<256x256xbf16>, vector<16x256xf32> -> vector<16x256xf32>
    %c0_14 = arith.constant 0 : index
    %c0_15 = arith.constant 0 : index
    %15 = vector.load %arg8[%c0_14, %c0_15] : memref<1x256xf32, #tpu.memory_space<vmem>>, vector<1x256xf32>
    %16 = vector.broadcast %15 : vector<1x256xf32> to vector<16x256xf32>
    %17 = arith.addf %14, %16 : vector<16x256xf32>
    %cst_16 = arith.constant 0.000000e+00 : f32
    %18 = vector.broadcast %cst_16 : f32 to vector<16x256xf32>
    %19 = arith.maximumf %17, %18 : vector<16x256xf32>
    %20 = arith.truncf %19 : vector<16x256xf32> to vector<16x256xbf16>
    %c0_17 = arith.constant 0 : index
    %c0_18 = arith.constant 0 : index
    %21 = vector.load %arg9[%c0_17, %c0_18] : memref<256x128xbf16, #tpu.memory_space<vmem>>, vector<256x128xbf16>
    %cst_19 = arith.constant dense<0.000000e+00> : vector<16x128xf32>
    %22 = tpu.matmul %20, %21, %cst_19 {dimension_numbers = #tpu.dot_dimension_numbers<[1], [0], [0], [1], [0, 0, 1, 1], [], []>} : vector<16x256xbf16>, vector<256x128xbf16>, vector<16x128xf32> -> vector<16x128xf32>
    %c0_20 = arith.constant 0 : index
    %c0_21 = arith.constant 0 : index
    %23 = vector.load %arg10[%c0_20, %c0_21] : memref<1x128xf32, #tpu.memory_space<vmem>>, vector<1x128xf32>
    %24 = vector.broadcast %23 : vector<1x128xf32> to vector<16x128xf32>
    %25 = arith.addf %22, %24 : vector<16x128xf32>
    %cst_22 = arith.constant 0.000000e+00 : f32
    %26 = vector.broadcast %cst_22 : f32 to vector<16x128xf32>
    %27 = arith.maximumf %25, %26 : vector<16x128xf32>
    %28 = vector.extract_strided_slice %27 {offsets = [0, 0], sizes = [16, 32], strides = [1, 1]} : vector<16x128xf32> to vector<16x32xf32>
    %29 = vector.extract_strided_slice %27 {offsets = [0, 32], sizes = [16, 32], strides = [1, 1]} : vector<16x128xf32> to vector<16x32xf32>
    %30 = vector.extract_strided_slice %27 {offsets = [0, 64], sizes = [16, 32], strides = [1, 1]} : vector<16x128xf32> to vector<16x32xf32>
    %31 = vector.extract_strided_slice %27 {offsets = [0, 96], sizes = [16, 32], strides = [1, 1]} : vector<16x128xf32> to vector<16x32xf32>
    %c0_23 = arith.constant 0 : index
    %c0_24 = arith.constant 0 : index
    %32 = vector.load %arg3[%c0_23, %c0_24] : memref<16x32xbf16, #tpu.memory_space<vmem>>, vector<16x32xbf16>
    %33 = arith.extf %32 : vector<16x32xbf16> to vector<16x32xf32>
    %cst_25 = arith.constant 5.000000e-01 : f32
    %34 = vector.broadcast %cst_25 : f32 to vector<16x32xf32>
    %35 = arith.mulf %34, %31 : vector<16x32xf32>
    %36 = math.exp %35 : vector<16x32xf32>
    %37 = arith.mulf %33, %36 : vector<16x32xf32>
    %38 = arith.addf %37, %30 : vector<16x32xf32>
    %c0_26 = arith.constant 0 : index
    %c0_27 = arith.constant 0 : index
    %39 = vector.load %arg11[%c0_26, %c0_27] : memref<16x32xf32, #tpu.memory_space<vmem>>, vector<16x32xf32>
    tpu.vector_store %arg11[%c0_26, %c0_27], %38 {strides = array<i32>} : memref<16x32xf32, #tpu.memory_space<vmem>>, vector<16x32xf32>,
    %cst_28 = arith.constant 0.000000e+00 : f32
    %40 = vector.broadcast %cst_28 : f32 to vector<16x32xf32>
    %41 = arith.subf %40, %29 : vector<16x32xf32>
    %42 = math.exp %41 : vector<16x32xf32>
    %43 = arith.subf %31, %29 : vector<16x32xf32>
    %cst_29 = arith.constant 1.000000e+00 : f32
    %44 = vector.broadcast %cst_29 : f32 to vector<16x32xf32>
    %45 = arith.addf %44, %43 : vector<16x32xf32>
    %46 = arith.subf %28, %30 : vector<16x32xf32>
    %47 = arith.mulf %46, %46 : vector<16x32xf32>
    %48 = arith.mulf %47, %42 : vector<16x32xf32>
    %49 = arith.subf %45, %48 : vector<16x32xf32>
    %50 = math.exp %43 : vector<16x32xf32>
    %51 = arith.subf %49, %50 : vector<16x32xf32>
    %cst_30 = arith.constant dense<0.000000e+00> : vector<16xf32>
    %52 = vector.multi_reduction <add>, %51, %cst_30 [1] : vector<16x32xf32> to vector<16xf32>
    %53 = vector.shape_cast %52 : vector<16xf32> to vector<16x1xf32>
    %cst_31 = arith.constant -5.000000e-01 : f32
    %54 = vector.broadcast %cst_31 : f32 to vector<16x1xf32>
    %55 = arith.mulf %54, %53 : vector<16x1xf32>
    %c16_i32 = arith.constant 16 : i32
    %56 = arith.muli %arg0, %c16_i32 : i32
    %57 = tpu.iota {dimensions = array<i32: 0>} : vector<16x1xi32>
    %58 = vector.broadcast %56 : i32 to vector<16x1xi32>
    %59 = arith.addi %58, %57 : vector<16x1xi32>
    %c16_i32_32 = arith.constant 16 : i32
    %60 = vector.broadcast %c16_i32_32 : i32 to vector<16x1xi32>
    %61 = arith.cmpi slt, %59, %60 : vector<16x1xi32>
    %cst_33 = arith.constant 0.000000e+00 : f32
    %62 = vector.broadcast %cst_33 : f32 to vector<16x1xf32>
    %63 = arith.select %61, %55, %62 : vector<16x1xi1>, vector<16x1xf32>
    %64 = vector.shape_cast %63 : vector<16x1xf32> to vector<1x16x1xf32>
    %cst_34 = arith.constant dense<0.000000e+00> : vector<1xf32>
    %65 = vector.multi_reduction <add>, %64, %cst_34 [1, 2] : vector<1x16x1xf32> to vector<1xf32>
    %66 = vector.shape_cast %65 : vector<1xf32> to vector<1x1x1xf32>
    %67 = vector.extract %66[0, 0, 0] : f32 from vector<1x1x1xf32>
    %68 = vector.broadcast %67 : f32 to vector<1x8x128xf32>
    %c0_35 = arith.constant 0 : index
    %c0_36 = arith.constant 0 : index
    %c0_37 = arith.constant 0 : index
    %69 = vector.load %arg12[%c0_35, %c0_36, %c0_37] : memref<1x8x128xf32, #tpu.memory_space<vmem>>, vector<1x8x128xf32>
    tpu.vector_store %arg12[%c0_35, %c0_36, %c0_37], %68 {strides = array<i32>} : memref<1x8x128xf32, #tpu.memory_space<vmem>>, vector<1x8x128xf32>,
    return
  }
  func.func @transform_0(%arg0: i32) -> (i32, i32) {
    %c0_i32 = arith.constant 0 : i32
    %c0_i32_0 = arith.constant 0 : i32
    return %arg0, %c0_i32 : i32, i32
  }
  func.func @transform_1(%arg0: i32) -> (i32, i32) {
    %c0_i32 = arith.constant 0 : i32
    %c0_i32_0 = arith.constant 0 : i32
    return %arg0, %c0_i32 : i32, i32
  }
  func.func @transform_2(%arg0: i32) -> (i32, i32) {
    %c0_i32 = arith.constant 0 : i32
    %c0_i32_0 = arith.constant 0 : i32
    return %arg0, %c0_i32 : i32, i32
  }
  func.func @transform_3(%arg0: i32) -> (i32, i32) {
    %c0_i32 = arith.constant 0 : i32
    %c0_i32_0 = arith.constant 0 : i32
    %c0_i32_1 = arith.constant 0 : i32
    return %c0_i32, %c0_i32_0 : i32, i32
  }
  func.func @transform_4(%arg0: i32) -> (i32, i32) {
    %c0_i32 = arith.constant 0 : i32
    %c0_i32_0 = arith.constant 0 : i32
    %c0_i32_1 = arith.constant 0 : i32
    return %c0_i32, %c0_i32_0 : i32, i32
  }
  func.func @transform_5(%arg0: i32) -> (i32, i32) {
    %c0_i32 = arith.constant 0 : i32
    %c0_i32_0 = arith.constant 0 : i32
    %c0_i32_1 = arith.constant 0 : i32
    return %c0_i32, %c0_i32_0 : i32, i32
  }
  func.func @transform_6(%arg0: i32) -> (i32, i32) {
    %c0_i32 = arith.constant 0 : i32
    %c0_i32_0 = arith.constant 0 : i32
    %c0_i32_1 = arith.constant 0 : i32
    return %c0_i32, %c0_i32_0 : i32, i32
  }
  func.func @transform_7(%arg0: i32) -> (i32, i32) {
    %c0_i32 = arith.constant 0 : i32
    %c0_i32_0 = arith.constant 0 : i32
    %c0_i32_1 = arith.constant 0 : i32
    return %c0_i32, %c0_i32_0 : i32, i32
  }
  func.func @transform_8(%arg0: i32) -> (i32, i32) {
    %c0_i32 = arith.constant 0 : i32
    %c0_i32_0 = arith.constant 0 : i32
    %c0_i32_1 = arith.constant 0 : i32
    return %c0_i32, %c0_i32_0 : i32, i32
  }
  func.func @transform_9(%arg0: i32) -> (i32, i32) {
    %c0_i32 = arith.constant 0 : i32
    %c0_i32_0 = arith.constant 0 : i32
    %c0_i32_1 = arith.constant 0 : i32
    return %c0_i32, %c0_i32_0 : i32, i32
  }
  func.func @transform_10(%arg0: i32) -> (i32, i32) {
    %c0_i32 = arith.constant 0 : i32
    %c0_i32_0 = arith.constant 0 : i32
    return %arg0, %c0_i32 : i32, i32
  }
  func.func @transform_11(%arg0: i32) -> (i32, i32, i32) {
    %c0_i32 = arith.constant 0 : i32
    %c0_i32_0 = arith.constant 0 : i32
    %c0_i32_1 = arith.constant 0 : i32
    return %arg0, %c0_i32, %c0_i32_0 : i32, i32, i32
  }
}

</mosaic_0001>

<bundles_post_ra>
// kernel: tpu_custom_call.1
= control target key start
LH: loop header
LB: loop body
LE: loop exit
PB: predicated region body
PF: predicated region fallthrough
CT: control target
= control target key end

     0   :  { %17 = vsyncpa [#allocation3], 0  ;;  %s1563_s0 = inlined_call_operand.hbm [shape: bf16[16,32], index: 0, kind: input, shape index: {}]   ;;  %s1564_s1 = inlined_call_operand.hbm [shape: bf16[16,32], index: 1, kind: input, shape index: {}]   ;;  %s1565_s2 = inlined_call_operand.hbm [shape: bf16[16,32], index: 2, kind: input, shape index: {}]   ;;  %s1566_s3 = inlined_call_operand.hbm [shape: bf16[32,256], index: 3, kind: input, shape index: {}]   ;;  %s1567_s4 = inlined_call_operand.hbm [shape: bf16[32,256], index: 4, kind: input, shape index: {}]   ;;  %s1568_s5 = inlined_call_operand.vmem [shape: f32[1,256], index: 5, kind: input, shape index: {}]   ;;  %s1569_s6 = inlined_call_operand.hbm [shape: bf16[256,256], index: 6, kind: input, shape index: {}]   ;;  %s1570_s7 = inlined_call_operand.vmem [shape: f32[1,256], index: 7, kind: input, shape index: {}]   ;;  %s1571_s8 = inlined_call_operand.hbm [shape: bf16[256,128], index: 8, kind: input, shape index: {}]   ;;  %s1572_s9 = inlined_call_operand.vmem [shape: f32[1,128], index: 9, kind: input, shape index: {}]   ;;  %s1573_s10 = inlined_call_operand.hbm [shape: f32[16,32], index: 10, kind: output, shape index: {0}]   ;;  %s1574_s11 = inlined_call_operand.hbm [shape: f32[1,8,128], index: 11, kind: output, shape index: {1}]  }
   0x1   :  { %18 = vsyncpa [#allocation6], 0 }
   0x2   :  { %19 = vsyncpa [#allocation9], 0 }
   0x3   :  { %20 = vsyncpa [#allocation12], 0 }
   0x4   :  { %21 = vsyncpa [#allocation4], 0 }
   0x5   :  { %22 = vsyncpa [#allocation16], 0  ;;  %s40_s19 = sshll.u32 %s1564_s1, 4  ;;  %s1418_s20 = smov [#allocation5]   ;;  %s41_s19 = int_to_ptr.hbm [resolvable:$true] %s40_s19 }
   0x6   :  { %s42_s21 = sshll.u32 %s1418_s20, 4  ;;  %s66_s24 = sshll.u32 %s1566_s3, 4  ;;  %s43_s21 = int_to_ptr.vmem [resolvable:$true] %s42_s21  ;;  %s67_s24 = int_to_ptr.hbm [resolvable:$true] %s66_s24 }
   0x7   :  { %s1419_s25 = smov 64   ;;  %s1420_s26 = smov 4  }
   0x8   :  { %48 = dma.hbm_to_vmem [thread:$0]  %s41_s19, 128, %s43_s21, [#allocation6], %s1419_s25, %s1419_s25, %s1420_s26  }
   0x9   :  { %s1421_s27 = smov [#allocation8]   ;;  %s1422_s29 = smov 128  }
   0xa   :  { %s68_s28 = sshll.u32 %s1421_s27, 4  ;;  %s1423_s1 = smov 8   ;;  %s69_s28 = int_to_ptr.vmem [resolvable:$true] %s68_s28 }
   0xb   :  { %74 = dma.hbm_to_vmem [thread:$0]  %s67_s24, 512, %s69_s28, [#allocation9], %s1422_s29, %s1422_s29, %s1423_s1  }
   0xc   :  { %s94_s3 = sshll.u32 %s1569_s6, 4  ;;  %s1424_s13 = smov [#allocation11]   ;;  %s95_s3 = int_to_ptr.hbm [resolvable:$true] %s94_s3 }
   0xd   :  { %s96_s14 = sshll.u32 %s1424_s13, 4  ;;  %s27_s17 = sshll.u32 %s1563_s0, 4  ;;  %s97_s14 = int_to_ptr.vmem [resolvable:$true] %s96_s14  ;;  %s28_s17 = int_to_ptr.hbm [resolvable:$true] %s27_s17 }
   0xe   :  { %102 = dma.hbm_to_vmem [thread:$0]  %s95_s3, 4096, %s97_s14, [#allocation12], %s1422_s29, %s1422_s29, %s1423_s1  }
   0xf   :  { %s1425_s18 = smov [#allocation2]   ;;  %s53_s22 = sshll.u32 %s1565_s2, 4  ;;  %s54_s22 = int_to_ptr.hbm [resolvable:$true] %s53_s22 }
  0x10   :  { %s29_s19 = sshll.u32 %s1425_s18, 4  ;;  %s79_s0 = sshll.u32 %s1567_s4, 4  ;;  %s30_s19 = int_to_ptr.vmem [resolvable:$true] %s29_s19  ;;  %s80_s0 = int_to_ptr.hbm [resolvable:$true] %s79_s0 }
  0x11   :  { %35 = dma.hbm_to_vmem [thread:$0]  %s28_s17, 128, %s30_s19, [#allocation3], %s1419_s25, %s1419_s25, %s1420_s26  }
  0x12   :  { %s1426_s24 = smov [#allocation7]   ;;  %s1427_s28 = smov [#allocation10]  }
  0x13   :  { %s55_s27 = sshll.u32 %s1426_s24, 4  ;;  %s81_s2 = sshll.u32 %s1427_s28, 4  ;;  %s56_s27 = int_to_ptr.vmem [resolvable:$true] %s55_s27  ;;  %s82_s2 = int_to_ptr.vmem [resolvable:$true] %s81_s2 }
  0x14   :  { %61 = dma.hbm_to_vmem [thread:$0]  %s54_s22, 128, %s56_s27, [#allocation6], %s1419_s25, %s1419_s25, %s1420_s26  }
  0x15   :  { %s109_s3 = sshll.u32 %s1571_s8, 4  ;;  %s1428_s4 = smov [#allocation13]   ;;  %s110_s3 = int_to_ptr.hbm [resolvable:$true] %s109_s3 }
  0x16   :  { %87 = dma.hbm_to_vmem [thread:$0]  %s80_s0, 512, %s82_s2, [#allocation9], %s1422_s29, %s1422_s29, %s1423_s1  }
  0x17   :  { %s111_s13 = sshll.u32 %s1428_s4, 4  ;;  %s112_s13 = int_to_ptr.vmem [resolvable:$true] %s111_s13 }
  0x18   :  { %117 = dma.hbm_to_vmem [thread:$0]  %s110_s3, 2048, %s112_s13, [#allocation12], %s1419_s25, %s1419_s25, %s1420_s26  }
  0x19   :  { %1406 = dma.done.wait [#allocation3], 128  }
  0x1a   :  { %1407 = vsyncadd [#allocation3], 4294967168 }
  0x1b   :  { %1408 = dma.done.wait [#allocation6], 256  }
  0x1c   :  { %1409 = vsyncadd [#allocation6], 4294967040 }
  0x1d   :  { %1410 = dma.done.wait [#allocation9], 1024  }
  0x1e   :  { %1411 = vsyncadd [#allocation9], 4294966272 }
  0x1f   :  { %1412 = dma.done.wait [#allocation12], 6144  }
  0x20   :  { %1413 = vsyncadd [#allocation12], 4294961152  ;;  %v876_v0 = vld [vmem:[#allocation10 + $0x10] sm:$0xf]  ;;  %v1107_v1 = vld [vmem:[#allocation10 + $0x14] sm:$0xf0] }
  0x21   :  { %v1106_v2 = vld [vmem:[#allocation10 + $0x14] sm:$0xf]  ;;  %v877_v3 = vor.u32 %v1107_v1, %v876_v0  ;;  %v878_v4 = vld [vmem:[#allocation10 + $0x18] sm:$0xf0]  ;;  %v868_v5 = vld [vmem:[#allocation10] sm:$0xf] }
  0x22   :  { %v1105_v6 = vld [vmem:[#allocation10 + $0x4] sm:$0xf0]  ;;  %v881_v7 = vor.u32 %v1106_v2, %v878_v4  ;;  %v1104_v8 = vld [vmem:[#allocation10 + $0x4] sm:$0xf]  ;;  %v870_v9 = vld [vmem:[#allocation10 + $0x8] sm:$0xf0] }
  0x23   :  { %196 = vmatpush.bf16.msra.mxu2 %v877_v3  ;;  %v869_v10 = vor.u32 %v1105_v6, %v868_v5  ;;  %v898_v11 = vld [vmem:[#allocation8 + $0x10] sm:$0xf]  ;;  %v1103_v12 = vld [vmem:[#allocation8 + $0x14] sm:$0xf0]  ;;  %v1102_v13 = vld [vmem:[#allocation8 + $0x14] sm:$0xf]  ;;  %v873_v14 = vor.u32 %v1104_v8, %v870_v9 }
  0x24   :  { %210 = vmatpush.bf16.msra.mxu3 %v881_v7  ;;  %v899_v15 = vor.u32 %v1103_v12, %v898_v11  ;;  %v900_v16 = vld [vmem:[#allocation8 + $0x18] sm:$0xf0]  ;;  %v1099_v17 = vld [vmem:[#allocation5] sm:$0xff]  ;;  %v890_v19 = vld [vmem:[#allocation8] sm:$0xf]  ;;  %vm186_vm0 = vcmask 261120  }
  0x25   :  { %v903_v18 = vor.u32 %v1102_v13, %v900_v16  ;;  %v1101_v20 = vld [vmem:[#allocation8 + $0x4] sm:$0xf0]  ;;  %v1100_v21 = vld [vmem:[#allocation8 + $0x4] sm:$0xf]  ;;  %v892_v22 = vld [vmem:[#allocation8 + $0x8] sm:$0xf0] }
  0x26   :  { %v891_v23 = vor.u32 %v1101_v20, %v890_v19  ;;  %v895_v24 = vor.u32 %v1100_v21, %v892_v22  ;;  %v1098_v25 = vld [vmem:[#allocation2] sm:$0xff]  ;;  %v964_v26 = vld [vmem:[#allocation11 + $0x70] sm:$0xf]  ;;  %v1123_v27 = vld [vmem:[#allocation11 + $0x74] sm:$0xf0]  ;;  %vm809_vm1 = vcmask 7168  }
  0x27   :  { %197 = vmatpush.bf16.msra.mxu2 %v869_v10  ;;  %v1028_v28 = vld [vmem:[#allocation11 + $0xf0] sm:$0xf]  ;;  %v965_v29 = vor.u32 %v1123_v27, %v964_v26  ;;  %v1139_v30 = vld [vmem:[#allocation11 + $0xf4] sm:$0xf0]  ;;  %v1122_v31 = vld [vmem:[#allocation11 + $0x74] sm:$0xf] }
  0x28   :  { %211 = vmatpush.bf16.msra.mxu3 %v873_v14  ;;  %v966_v32 = vld [vmem:[#allocation11 + $0x78] sm:$0xf0]  ;;  %v1029_v33 = vor.u32 %v1139_v30, %v1028_v28  ;;  %v1138_v35 = vld [vmem:[#allocation11 + $0xf4] sm:$0xf]  ;;  %v956_v37 = vld [vmem:[#allocation11 + $0x60] sm:$0xf] }
  0x29   :  { %v969_v34 = vor.u32 %v1122_v31, %v966_v32  ;;  %v1030_v36 = vld [vmem:[#allocation11 + $0xf8] sm:$0xf0]  ;;  %488 = vmatpush.bf16.msra.mxu0 %v965_v29  ;;  %v1121_v39 = vld [vmem:[#allocation11 + $0x64] sm:$0xf0]  ;;  %v1020_v40 = vld [vmem:[#allocation11 + $0xe0] sm:$0xf] }
  0x2a   :  { %882 = vmatmul.msk.bf16.vlgmr.msra.gmra.mxu2 %vm186_vm0, %v1099_v17  ;;  %v1033_v38 = vor.u32 %v1138_v35, %v1030_v36  ;;  %v1137_v41 = vld [vmem:[#allocation11 + $0xe4] sm:$0xf0]  ;;  %502 = vmatpush.bf16.msra.mxu1 %v1029_v33  ;;  %v957_v42 = vor.u32 %v1121_v39, %v956_v37  ;;  %v1120_v44 = vld [vmem:[#allocation11 + $0x64] sm:$0xf]  ;;  %v958_v45 = vld [vmem:[#allocation11 + $0x68] sm:$0xf0] }
  0x2b   :  { %252 = vmatpush.bf16.msrb.mxu2 %v899_v15  ;;  %883 = vmatmul.msk.bf16.vlgmr.msra.gmra.mxu3 %vm186_vm0, %v1099_v17  ;;  %v1021_v43 = vor.u32 %v1137_v41, %v1020_v40  ;;  %v1136_v46 = vld [vmem:[#allocation11 + $0xe4] sm:$0xf]  ;;  %v961_v47 = vor.u32 %v1120_v44, %v958_v45  ;;  %v1022_v48 = vld [vmem:[#allocation11 + $0xe8] sm:$0xf0]  ;;  %v948_v50 = vld [vmem:[#allocation11 + $0x50] sm:$0xf] }
  0x2c   :  { %266 = vmatpush.bf16.msrb.mxu3 %v903_v18  ;;  %v1025_v49 = vor.u32 %v1136_v46, %v1022_v48  ;;  %v1119_v51 = vld [vmem:[#allocation11 + $0x54] sm:$0xf0]  ;;  %v1012_v52 = vld [vmem:[#allocation11 + $0xd0] sm:$0xf]  ;;  %v1118_v55 = vld [vmem:[#allocation11 + $0x54] sm:$0xf] }
  0x2d   :  { %489 = vmatpush.bf16.msra.mxu0 %v957_v42  ;;  %v949_v53 = vor.u32 %v1119_v51, %v948_v50  ;;  %v1135_v54 = vld [vmem:[#allocation11 + $0xd4] sm:$0xf0]  ;;  %v950_v56 = vld [vmem:[#allocation11 + $0x58] sm:$0xf0]  ;;  %v1134_v59 = vld [vmem:[#allocation11 + $0xd4] sm:$0xf] }
  0x2e   :  { %503 = vmatpush.bf16.msra.mxu1 %v1021_v43  ;;  %v1013_v57 = vor.u32 %v1135_v54, %v1012_v52  ;;  %v953_v58 = vor.u32 %v1118_v55, %v950_v56  ;;  %v1014_v60 = vld [vmem:[#allocation11 + $0xd8] sm:$0xf0]  ;;  %v940_v61 = vld [vmem:[#allocation11 + $0x40] sm:$0xf]  ;;  %v1117_v63 = vld [vmem:[#allocation11 + $0x44] sm:$0xf0] }
  0x2f   :  { %253 = vmatpush.bf16.msrb.mxu2 %v891_v23  ;;  %v1017_v62 = vor.u32 %v1134_v59, %v1014_v60  ;;  %v1004_v0 = vld [vmem:[#allocation11 + $0xc0] sm:$0xf]  ;;  %v1133_v1 = vld [vmem:[#allocation11 + $0xc4] sm:$0xf0]  ;;  %v941_v2 = vor.u32 %v1117_v63, %v940_v61  ;;  %v1116_v4 = vld [vmem:[#allocation11 + $0x44] sm:$0xf] }
  0x30   :  { %267 = vmatpush.bf16.msrb.mxu3 %v895_v24  ;;  %v1005_v3 = vor.u32 %v1133_v1, %v1004_v0  ;;  %v942_v5 = vld [vmem:[#allocation11 + $0x48] sm:$0xf0]  ;;  %v1132_v6 = vld [vmem:[#allocation11 + $0xc4] sm:$0xf]  ;;  %v932_v10 = vld [vmem:[#allocation11 + $0x30] sm:$0xf] }
  0x31   :  { %490 = vmatpush.bf16.msra.mxu0 %v949_v53  ;;  %v945_v7 = vor.u32 %v1116_v4, %v942_v5  ;;  %v1006_v8 = vld [vmem:[#allocation11 + $0xc8] sm:$0xf0]  ;;  %v1115_v11 = vld [vmem:[#allocation11 + $0x34] sm:$0xf0]  ;;  %v996_v12 = vld [vmem:[#allocation11 + $0xb0] sm:$0xf] }
  0x32   :  { %504 = vmatpush.bf16.msra.mxu1 %v1013_v57  ;;  %v1009_v9 = vor.u32 %v1132_v6, %v1006_v8  ;;  %v933_v13 = vor.u32 %v1115_v11, %v932_v10  ;;  %v1131_v14 = vld [vmem:[#allocation11 + $0xb4] sm:$0xf0]  ;;  %v1114_v15 = vld [vmem:[#allocation11 + $0x34] sm:$0xf]  ;;  %v934_v17 = vld [vmem:[#allocation11 + $0x38] sm:$0xf0] }
  0x33   :  { %516 = vmatpush.bf16.msra.mxu2 %v969_v34  ;;  %v997_v16 = vor.u32 %v1131_v14, %v996_v12  ;;  %v1130_v18 = vld [vmem:[#allocation11 + $0xb4] sm:$0xf]  ;;  %v937_v19 = vor.u32 %v1114_v15, %v934_v17  ;;  %v998_v20 = vld [vmem:[#allocation11 + $0xb8] sm:$0xf0]  ;;  %v924_v22 = vld [vmem:[#allocation11 + $0x20] sm:$0xf] }
  0x34   :  { %530 = vmatpush.bf16.msra.mxu3 %v1033_v38  ;;  %v1001_v21 = vor.u32 %v1130_v18, %v998_v20  ;;  %v1113_v23 = vld [vmem:[#allocation11 + $0x24] sm:$0xf0]  ;;  %v988_v24 = vld [vmem:[#allocation11 + $0xa0] sm:$0xf]  ;;  %v1112_v27 = vld [vmem:[#allocation11 + $0x24] sm:$0xf] }
  0x35   :  { %491 = vmatpush.bf16.msra.mxu0 %v941_v2  ;;  %v1129_v26 = vld [vmem:[#allocation11 + $0xa4] sm:$0xf0]  ;;  %v926_v28 = vld [vmem:[#allocation11 + $0x28] sm:$0xf0]  ;;  %v1128_v31 = vld [vmem:[#allocation11 + $0xa4] sm:$0xf] }
  0x36   :  { %505 = vmatpush.bf16.msra.mxu1 %v1005_v3  ;;  %v989_v29 = vor.u32 %v1129_v26, %v988_v24  ;;  %v929_v30 = vor.u32 %v1112_v27, %v926_v28  ;;  %v990_v32 = vld [vmem:[#allocation11 + $0xa8] sm:$0xf0]  ;;  %v916_v34 = vld [vmem:[#allocation11 + $0x10] sm:$0xf]  ;;  %v1111_v35 = vld [vmem:[#allocation11 + $0x14] sm:$0xf0] }
  0x37   :  { %517 = vmatpush.bf16.msra.mxu2 %v961_v47  ;;  %v993_v33 = vor.u32 %v1128_v31, %v990_v32  ;;  %v980_v36 = vld [vmem:[#allocation11 + $0x90] sm:$0xf]  ;;  %v917_v37 = vor.u32 %v1111_v35, %v916_v34  ;;  %v1127_v38 = vld [vmem:[#allocation11 + $0x94] sm:$0xf0]  ;;  %v1110_v39 = vld [vmem:[#allocation11 + $0x14] sm:$0xf] }
  0x38   :  { %531 = vmatpush.bf16.msra.mxu3 %v1025_v49  ;;  %v918_v40 = vld [vmem:[#allocation11 + $0x18] sm:$0xf0]  ;;  %v981_v41 = vor.u32 %v1127_v38, %v980_v36  ;;  %v1126_v43 = vld [vmem:[#allocation11 + $0x94] sm:$0xf]  ;;  %v908_v46 = vld [vmem:[#allocation11] sm:$0xf] }
  0x39   :  { %492 = vmatpush.bf16.msra.mxu0 %v933_v13  ;;  %v921_v42 = vor.u32 %v1110_v39, %v918_v40  ;;  %v982_v44 = vld [vmem:[#allocation11 + $0x98] sm:$0xf0]  ;;  %v1109_v47 = vld [vmem:[#allocation11 + $0x4] sm:$0xf0]  ;;  %v972_v48 = vld [vmem:[#allocation11 + $0x80] sm:$0xf] }
  0x3a   :  { %904 = vmatmul.msk.bf16.vlgmr.msrb.gmra.mxu2 %vm186_vm0, %v1098_v25  ;;  %506 = vmatpush.bf16.msra.mxu1 %v997_v16  ;;  %v985_v45 = vor.u32 %v1126_v43, %v982_v44  ;;  %v909_v49 = vor.u32 %v1109_v47, %v908_v46  ;;  %v1125_v50 = vld [vmem:[#allocation11 + $0x84] sm:$0xf0]  ;;  %v1108_v51 = vld [vmem:[#allocation11 + $0x4] sm:$0xf]  ;;  %v910_v52 = vld [vmem:[#allocation11 + $0x8] sm:$0xf0] }
  0x3b   :  { %905 = vmatmul.msk.bf16.vlgmr.msrb.gmra.mxu3 %vm186_vm0, %v1098_v25  ;;  %518 = vmatpush.bf16.msra.mxu2 %v953_v58  ;;  %v925_v25 = vor.u32 %v1113_v23, %v924_v22  ;;  %v973_v53 = vor.u32 %v1125_v50, %v972_v48  ;;  %v913_v54 = vor.u32 %v1108_v51, %v910_v52  ;;  %v1124_v55 = vld [vmem:[#allocation11 + $0x84] sm:$0xf]  ;;  %v974_v56 = vld [vmem:[#allocation11 + $0x88] sm:$0xf0]  ;;  %v1147_v60 = vld [vmem:[#allocation13 + $0x38] sm:$0xff]  ;;  %s1431_s16 = smov [#allocation14]  }
  0x3c   :  { %532 = vmatpush.bf16.msra.mxu3 %v1017_v62  ;;  %v977_v57 = vor.u32 %v1124_v55, %v974_v56  ;;  %v1155_v61 = vld [vmem:[#allocation13 + $0x78] sm:$0xff]  ;;  %v1146_v62 = vld [vmem:[#allocation13 + $0x30] sm:$0xff]  ;;  %v1145_v1 = vld [vmem:[#allocation13 + $0x28] sm:$0xff]  ;;  %s828_s17 = sshll.u32 %s1431_s16, 4  ;;  %s830_s20 = sshll.u32 %s1573_s10, 4  ;;  %s829_s17 = int_to_ptr.vmem [resolvable:$true] %s828_s17  ;;  %s831_s20 = int_to_ptr.hbm [resolvable:$true] %s830_s20 }
  0x3d   :  { %493 = vmatpush.bf16.msra.mxu0 %v925_v25  ;;  %v1154_v63 = vld [vmem:[#allocation13 + $0x70] sm:$0xff]  ;;  %v1144_v3 = vld [vmem:[#allocation13 + $0x20] sm:$0xff]  ;;  %v274_v6 = vld [vmem:[%s1568_s5] sm:$0x3]  ;;  %s1432_s21 = smov [#allocation15]   ;;  %s844_s10 = sshll.u32 %s1574_s11, 4  ;;  %s845_s10 = int_to_ptr.hbm [resolvable:$true] %s844_s10 }
  0x3e   :  { %507 = vmatpush.bf16.msra.mxu1 %v989_v29  ;;  %v276_v8 = vperm.slane %v274_v6, 0  ;;  %v277_v10 = vperm.slane %v274_v6, 1  ;;  %v1153_v25 = vld [vmem:[#allocation13 + $0x68] sm:$0xff]  ;;  %v1143_v26 = vld [vmem:[#allocation13 + $0x18] sm:$0xff]  ;;  %v1152_v27 = vld [vmem:[#allocation13 + $0x60] sm:$0xff]  ;;  %s842_s22 = sshll.u32 %s1432_s21, 4  ;;  %s843_s22 = int_to_ptr.vmem [resolvable:$true] %s842_s22 }
  0x3f   :  { %519 = vmatpush.bf16.msra.mxu2 %v945_v7  ;;  %v1142_v28 = vld [vmem:[#allocation13 + $0x10] sm:$0xff]  ;;  %v1151_v29 = vld [vmem:[#allocation13 + $0x58] sm:$0xff]  ;;  %v1140_v32 = vld [vmem:[#allocation13] sm:$0xff] }
  0x40   :  { %533 = vmatpush.bf16.msra.mxu3 %v1009_v9  ;;  %v1150_v31 = vld [vmem:[#allocation13 + $0x50] sm:$0xff]  ;;  %v1148_v34 = vld [vmem:[#allocation13 + $0x40] sm:$0xff]  ;;  %v322_v35 = vld [vmem:[%s1570_s7] sm:$0x3] }
  0x41   :  { %494 = vmatpush.bf16.msra.mxu0 %v917_v37  ;;  %v324_v37 = vperm.slane %v322_v35, 0 }
  0x42   :  { %508 = vmatpush.bf16.msra.mxu1 %v981_v41  ;;  %v325_v41 = vperm.slane %v322_v35, 1 }
  0x43   :  { %520 = vmatpush.bf16.msra.mxu2 %v937_v19 }
  0x44   :  { %534 = vmatpush.bf16.msra.mxu3 %v1001_v21 }
  0x45   :  { %495 = vmatpush.bf16.msra.mxu0 %v909_v49 }
  0x46   :  { %509 = vmatpush.bf16.msra.mxu1 %v973_v53 }
  0x47   :  { %521 = vmatpush.bf16.msra.mxu2 %v929_v30  ;;  %v1141_v30 = vld [vmem:[#allocation13 + $0x8] sm:$0xff] }
  0x48   :  { %535 = vmatpush.bf16.msra.mxu3 %v993_v33  ;;  %v1149_v33 = vld [vmem:[#allocation13 + $0x48] sm:$0xff] }
  0x49   :  { %682 = vmatpush.bf16.msrb.mxu0 %v1147_v60 }
  0x4a   :  { %696 = vmatpush.bf16.msrb.mxu1 %v1155_v61  ;;  %v1177_v61 = vld [vmem:[%s1572_s9] ss:$0 sm:$0xff]  ;;  %s1429_s9 = smov 96  }
  0x4b   :  { %522 = vmatpush.bf16.msra.mxu2 %v921_v42 }
  0x4c   :  { %536 = vmatpush.bf16.msra.mxu3 %v985_v45 }
  0x4d   :  { %683 = vmatpush.bf16.msrb.mxu0 %v1146_v62 }
  0x4e   :  { %697 = vmatpush.bf16.msrb.mxu1 %v1154_v63 }
  0x4f   :  { %523 = vmatpush.bf16.msra.mxu2 %v913_v54 }
  0x50   :  { %537 = vmatpush.bf16.msra.mxu3 %v977_v57 }
  0x51   :  { %684 = vmatpush.bf16.msrb.mxu0 %v1145_v1 }
  0x52   :  { %698 = vmatpush.bf16.msrb.mxu1 %v1153_v25 }
  0x55   :  { %685 = vmatpush.bf16.msrb.mxu0 %v1144_v3 }
  0x56   :  { %699 = vmatpush.bf16.msrb.mxu1 %v1152_v27 }
  0x59   :  { %686 = vmatpush.bf16.msrb.mxu0 %v1143_v26 }
  0x5a   :  { %700 = vmatpush.bf16.msrb.mxu1 %v1151_v29 }
  0x5d   :  { %687 = vmatpush.bf16.msrb.mxu0 %v1142_v28 }
  0x5e   :  { %701 = vmatpush.bf16.msrb.mxu1 %v1150_v31 }
  0x61   :  { %688 = vmatpush.bf16.msrb.mxu0 %v1141_v30 }
  0x62   :  { %702 = vmatpush.bf16.msrb.mxu1 %v1149_v33 }
  0x65   :  { %689 = vmatpush.bf16.msrb.mxu0 %v1140_v32 }
  0x66   :  { %703 = vmatpush.bf16.msrb.mxu1 %v1148_v34 }
  0xad   :  { %v199_v58 = vpop.f32.mrf.mxu2 }
  0xae   :  { %v213_v59 = vpop.f32.mrf.mxu3 }
  0xb5   :  { %v201_v0 = vpop.f32.mrf.mxu2 }
  0xb6   :  { %v215_v2 = vpop.f32.mrf.mxu3 }
  0xbd   :  { %v255_v4 = vpop.f32.mrf.mxu2 }
  0xbe   :  { %v269_v5 = vpop.f32.mrf.mxu3  ;;  %v256_v7 = vadd.f32 %v255_v4, %v199_v58 }
  0xbf   :  { %v270_v9 = vadd.f32 %v269_v5, %v213_v59 }
  0xc0   :  { %v280_v12 = vadd.f32 %v276_v8, %v256_v7 }
  0xc1   :  { %v281_v15 = vadd.f32 %v277_v10, %v270_v9 }
  0xc2   :  { %v284_v19 = vmax.f32 %v280_v12, 0.0 }
  0xc3   :  { %v285_v21 = vmax.f32 %v281_v15, 0.0 }
  0xc5   :  { %v257_v11 = vpop.f32.mrf.mxu2 }
  0xc6   :  { %v258_v13 = vadd.f32 %v257_v11, %v201_v0  ;;  %v271_v14 = vpop.f32.mrf.mxu3 }
  0xc7   :  { %v272_v16 = vadd.f32 %v271_v14, %v215_v2 }
  0xc8   :  { %v282_v17 = vadd.f32 %v276_v8, %v258_v13 }
  0xc9   :  { %v283_v18 = vadd.f32 %v277_v10, %v272_v16 }
  0xca   :  { %v286_v20 = vmax.f32 %v282_v17, 0.0 }
  0xcb   :  { %v287_v22 = vmax.f32 %v283_v18, 0.0 }
  0xcc   :  { %v288_v23 = vpack.c.bf16 %v286_v20, %v284_v19 }
  0xcd   :  { %v289_v24 = vpack.c.bf16 %v287_v22, %v285_v21 }
  0xce   :  { %496 = vmatmul.bf16.vlgmr.msra.gmra.mxu0 %v288_v23  ;;  %524 = vmatmul.bf16.vlgmr.msra.gmra.mxu2 %v288_v23 }
  0xcf   :  { %510 = vmatmul.bf16.vlgmr.msra.gmra.mxu1 %v289_v24  ;;  %538 = vmatmul.bf16.vlgmr.msra.gmra.mxu3 %v289_v24 }
 0x14b   :  { %v497_v36 = vpop.f32.mrf.mxu0 }
 0x14c   :  { %v511_v38 = vpop.f32.mrf.mxu1  ;;  %v498_v39 = vadd.f32 %v497_v36, %v324_v37 }
 0x14e   :  { %v512_v44 = vadd.f32 %v511_v38, %v498_v39 }
 0x150   :  { %v544_v49 = vmax.f32 %v512_v44, 0.0 }
 0x151   :  { %v525_v40 = vpop.f32.mrf.mxu2 }
 0x152   :  { %v539_v42 = vpop.f32.mrf.mxu3  ;;  %v526_v47 = vadd.f32 %v525_v40, %v325_v41 }
 0x153   :  { %v499_v43 = vpop.f32.mrf.mxu0 }
 0x154   :  { %v500_v45 = vadd.f32 %v499_v43, %v324_v37  ;;  %v513_v46 = vpop.f32.mrf.mxu1  ;;  %v540_v52 = vadd.f32 %v539_v42, %v526_v47 }
 0x156   :  { %v514_v48 = vadd.f32 %v513_v46, %v500_v45  ;;  %v545_v57 = vmax.f32 %v540_v52, 0.0  ;;  %v1157_v46 = vld [vmem:[#allocation7] sm:$0xff]  }
 0x157   :  { %v1158_v47 = vunpack.c.l.bf16 %v1157_v46 }
 0x158   :  { %v546_v50 = vmax.f32 %v514_v48, 0.0 }
 0x159   :  { %v527_v51 = vpop.f32.mrf.mxu2 }
 0x15a   :  { %v548_v53 = vpack.c.bf16 %v546_v50, %v544_v49  ;;  %v528_v54 = vadd.f32 %v527_v51, %v325_v41  ;;  %v541_v55 = vpop.f32.mrf.mxu3 }
 0x15c   :  { %v542_v56 = vadd.f32 %v541_v55, %v528_v54  ;;  %690 = vmatmul.bf16.vlgmr.msrb.gmra.mxu0 %v548_v53 }
 0x15e   :  { %v547_v58 = vmax.f32 %v542_v56, 0.0 }
 0x160   :  { %v549_v59 = vpack.c.bf16 %v547_v58, %v545_v57  ;;  %v1159_v57 = vunpack.c.h.bf16 %v1157_v46 }
 0x162   :  { %704 = vmatmul.bf16.vlgmr.msrb.gmra.mxu1 %v549_v59 }
 0x1d9   :  { %v691_v60 = vpop.f32.mrf.mxu0 }
 0x1da   :  { %v692_v62 = vadd.f32 %v1177_v61, %v691_v60 }
 0x1df   :  { %v705_v63 = vpop.f32.mrf.mxu1 }
 0x1e0   :  { %v706_v0 = vadd.f32 %v705_v63, %v692_v62 }
 0x1e1   :  { %v693_v2 = vpop.f32.mrf.mxu0 }
 0x1e2   :  { %v710_v1 = vmax.f32 %v706_v0, 0.0  ;;  %v694_v4 = vadd.f32 %v1177_v61, %v693_v2 }
 0x1e4   :  { %734 = vrot.lane.b32.xlu0 %v710_v1, %s1419_s25  ;;  %v744_v3 = vsub.f32 0.0, %v710_v1  ;;  %v716_v39 = vmul.f32 0.5, %v710_v1 }
 0x1e6   :  { %v746_v5 = vmul.f32 1.442695, %v744_v3  ;;  %v718_v40 = vmul.f32 1.442695, %v716_v39 }
 0x1e7   :  { %v707_v6 = vpop.f32.mrf.mxu1 }
 0x1e8   :  { %v708_v7 = vadd.f32 %v707_v6, %v694_v4  ;;  %1178 = vpow2.f32 %v746_v5 }
 0x1ea   :  { %v711_v8 = vmax.f32 %v708_v7, 0.0 }
 0x1ec   :  { %v745_v9 = vsub.f32 0.0, %v711_v8  ;;  %736 = vrot.lane.b32.xlu0 %v711_v8, %s1419_s25  ;;  %s1430_s25 = smov 32   ;;  %v717_v41 = vmul.f32 0.5, %v711_v8 }
 0x1ee   :  { %v748_v10 = vmul.f32 1.442695, %v745_v9  ;;  %v1179_v11 = vpop.eup %1178  ;;  %v720_v42 = vmul.f32 1.442695, %v717_v41 }
 0x1ef   :  { %758 = vrot.lane.b32.xlu1 %v1179_v11, %s1429_s9 }
 0x1f0   :  { %1180 = vpow2.f32 %v748_v10 }
 0x1f6   :  { %v1181_v12 = vpop.eup %1180 }
 0x1f7   :  { %760 = vrot.lane.b32.xlu1 %v1181_v12, %s1429_s9 }
 0x256   :  { %v735_v13 = vpop.permute.xlu0 %734 }
 0x257   :  { %v750_v14 = vsub.f32 %v710_v1, %v735_v13 }
 0x259   :  { %v754_v15 = vmul.f32 %v750_v14, %v750_v14  ;;  %v776_v23 = vmul.f32 1.442695, %v750_v14  ;;  %v752_v24 = vadd.f32 1.0, %v750_v14 }
 0x25b   :  { %1182 = vpow2.f32 %v776_v23 }
 0x25e   :  { %v737_v16 = vpop.permute.xlu0 %736 }
 0x25f   :  { %v751_v19 = vsub.f32 %v711_v8, %v737_v16 }
 0x261   :  { %v759_v17 = vpop.permute.xlu1 %758  ;;  %v755_v20 = vmul.f32 %v751_v19, %v751_v19  ;;  %v778_v25 = vmul.f32 1.442695, %v751_v19  ;;  %v1183_v28 = vpop.eup %1182  ;;  %v753_v30 = vadd.f32 1.0, %v751_v19 }
 0x262   :  { %v764_v18 = vmul.f32 %v759_v17, %v754_v15 }
 0x263   :  { %1184 = vpow2.f32 %v778_v25 }
 0x264   :  { %768 = vrot.lane.b32.xlu2 %v764_v18, %s1429_s9  ;;  %1186 = vpow2.f32 %v718_v40 }
 0x265   :  { %1188 = vpow2.f32 %v720_v42 }
 0x269   :  { %v761_v21 = vpop.permute.xlu1 %760  ;;  %v1185_v33 = vpop.eup %1184 }
 0x26a   :  { %v765_v22 = vmul.f32 %v761_v21, %v755_v20  ;;  %v1187_v43 = vpop.eup %1186 }
 0x26b   :  { %v1189_v44 = vpop.eup %1188 }
 0x26c   :  { %770 = vrot.lane.b32.xlu2 %v765_v22, %s1429_s9 }
 0x2be   :  { %v769_v26 = vpop.permute.xlu2 %768 }
 0x2bf   :  { %v774_v27 = vsub.f32 %v752_v24, %v769_v26 }
 0x2c1   :  { %v780_v29 = vsub.f32 %v774_v27, %v1183_v28 }
 0x2c3   :  { %784 = vrot.lane.b32.xlu0 %v780_v29, %s1430_s25 }
 0x2c6   :  { %v771_v31 = vpop.permute.xlu2 %770 }
 0x2c7   :  { %v775_v32 = vsub.f32 %v753_v30, %v771_v31 }
 0x2c9   :  { %v781_v34 = vsub.f32 %v775_v32, %v1185_v33 }
 0x2cb   :  { %786 = vrot.lane.b32.xlu1 %v781_v34, %s1430_s25 }
 0x335   :  { %v785_v35 = vpop.permute.xlu0 %784 }
 0x336   :  { %v790_v36 = vsel %vm186_vm0, %v785_v35, 0.0 }
 0x337   :  { %791 = vadd.xlane.f32.xlu2 %v790_v36 }
 0x33d   :  { %v787_v37 = vpop.permute.xlu1 %786 }
 0x33e   :  { %v793_v38 = vsel %vm186_vm0, %v787_v37, 0.0 }
 0x33f   :  { %794 = vadd.xlane.f32.xlu0 %v793_v38 }
 0x34f   :  { %724 = vrot.lane.b32.xlu2 %v1187_v43, %s1430_s25 }
 0x353   :  { %726 = vrot.lane.b32.xlu0 %v1189_v44, %s1430_s25 }
 0x3aa   :  { %v792_v45 = vpop.xlane.xlu2 %791 }
 0x3ab   :  { %v796_v48 = vmul.f32 -0.5, %v792_v45 }
 0x3ad   :  { %v810_v54 = vsel %vm809_vm1, %v796_v48, 0.0 }
 0x3b2   :  { %v795_v49 = vpop.xlane.xlu0 %794  ;;  %v725_v50 = vpop.permute.xlu2 %724 }
 0x3b3   :  { %v797_v51 = vmul.f32 -0.5, %v795_v49  ;;  %v730_v52 = vmul.f32 %v1158_v47, %v725_v50 }
 0x3b5   :  { %v740_v53 = vadd.f32 %v735_v13, %v730_v52  ;;  %v811_v55 = vsel %vm809_vm1, %v797_v51, 0.0 }
 0x3b6   :  { %v812_v56 = vadd.f32 %v811_v55, %v810_v54 }
 0x3b7   :  { %742 = vst.msk [vmem:[#allocation14] sm:$0xff] %vm186_vm0, %v740_v53 }
 0x3b8   :  { %813 = vadd.xlane.f32.xlu1 %v812_v56 }
 0x3c5   :  { %v727_v58 = vpop.permute.xlu0 %726 }
 0x3c6   :  { %v731_v59 = vmul.f32 %v1159_v57, %v727_v58 }
 0x3c8   :  { %v741_v60 = vadd.f32 %v737_v16, %v731_v59 }
 0x3ca   :  { %743 = vst.msk [vmem:[#allocation14 + $0x8] sm:$0xff] %vm186_vm0, %v741_v60 }
 0x3cb   :  { %836 = dma.vmem_to_hbm [thread:$0]  %s829_s17, 256, %s831_s20, [#allocation4], %s1422_s29, %s1422_s29, %s1423_s1  }
 0x42b   :  { %v814_v61 = vpop.xlane.xlu1 %813 }
 0x42c   :  { %v815_v62 = vrot.slane %v814_v61, 4 }
 0x42e   :  { %v816_v63 = vadd.f32 %v815_v62, %v814_v61 }
 0x430   :  { %v817_v0 = vrot.slane %v816_v63, 2 }
 0x432   :  { %v818_v1 = vadd.f32 %v817_v0, %v816_v63 }
 0x434   :  { %v819_v2 = vrot.slane %v818_v1, 1 }
 0x436   :  { %v820_v3 = vadd.f32 %v819_v2, %v818_v1 }
 0x438   :  { %1160 = vpush %v820_v3 }
 0x469   :  { %s1161_s0 = spop %1160 }
 0x46a   :  { %v822_v4 = vstv %s1161_s0 }
 0x46b   :  { %823 = vst [vmem:[#allocation15] sm:$0xff] %v822_v4 }
 0x46c   :  { %847 = dma.vmem_to_hbm [thread:$0]  %s843_s22, 128, %s845_s10, [#allocation16]  }
 0x46d   :  { %1414 = dma.done.wait [#allocation4], 256  }
 0x46e   :  { %1415 = vsyncadd [#allocation4], 4294967040 }
 0x46f   :  { %1416 = dma.done.wait [#allocation16], 128  }
 0x470   :  { %1417 = vsyncadd [#allocation16], 4294967168 }
 0x471   :  { %856 = vsyncpa [#allocation3], 1 }
 0x472   :  { %857 = vsyncpa [#allocation6], 1 }
 0x473   :  { %858 = vsyncpa [#allocation9], 1 }
 0x474   :  { %859 = vsyncpa [#allocation12], 1 }
 0x475   :  { %860 = vsyncpa [#allocation4], 1 }
 0x476   :  { %861 = vsyncpa [#allocation16], 1 }

</bundles_post_ra>
